<compile_context>
chip_gen: v7x
topology: tpu7x:2x2x1
jax: 0.10.0
libtpu: 0.0.40
codegen_flags: <defaults>
</compile_context>

<pallas_src>
import functools

import jax
import jax.numpy as jnp
from jax.experimental import pallas as pl
from jax.experimental.pallas import tpu as pltpu

LANE = 128            # lane-dense feature pad (feeds the MXU's 128 lanes)
TM = 128              # node-row tile for the large-N tiled path
ROW_PAD_SMALL = 16    # bf16 sublane multiple; row pad for the fused small-N path


# ---------------------------------------------------------------------------
# Fused kernel (small / medium graphs): entire forward in one VMEM-resident pass
# ---------------------------------------------------------------------------
def _fused_kernel(x_ref, a_ref, w_ref, b_ref, o_ref):
    f32 = jnp.float32
    # pre-MLP (1 layer; ReLU on its output because GNN/post stages follow)
    h = jnp.maximum(
        jnp.dot(x_ref[...], w_ref[0], preferred_element_type=f32) + b_ref[0], 0.0)
    # GCN layer 1: ReLU(A_hat @ (h @ W_g1) + b_g1)
    z = jnp.dot(h.astype(jnp.bfloat16), w_ref[1],
                preferred_element_type=f32).astype(jnp.bfloat16)
    h = jnp.maximum(jnp.dot(a_ref[...], z, preferred_element_type=f32) + b_ref[1], 0.0)
    # GCN layer 2 (act_last=True because a post-MLP exists)
    z = jnp.dot(h.astype(jnp.bfloat16), w_ref[2],
                preferred_element_type=f32).astype(jnp.bfloat16)
    h = jnp.maximum(jnp.dot(a_ref[...], z, preferred_element_type=f32) + b_ref[2], 0.0)
    # post-MLP (1 layer, final Linear).  pooling=None -> per-node logits.
    o_ref[...] = (jnp.dot(h.astype(jnp.bfloat16), w_ref[3],
                          preferred_element_type=f32) + b_ref[3]).astype(o_ref.dtype)
    # TODO(synk): dropout (p=0.0), BatchNorm (has_bn=False), SKIPSUM stage and pooling are
    # identity / absent in this instantiation and intentionally not emitted.


# ---------------------------------------------------------------------------
# Tiled kernels (large graphs): row-tiled "parallel" axis + column-tiled
# "arbitrary" reduction over A_hat with an f32 VMEM accumulator.
# ---------------------------------------------------------------------------
def _tiled_pre_kernel(x_ref, wpre_ref, bpre_ref, wg1_ref, z1_ref):
    """Row-wise: z1 = ReLU(x @ W_pre + b_pre) @ W_g1   (pre-MLP + GCN-1 projection)."""
    h = jnp.maximum(
        jnp.dot(x_ref[...], wpre_ref[...], preferred_element_type=jnp.float32)
        + bpre_ref[...], 0.0)
    z1_ref[...] = jnp.dot(h.astype(jnp.bfloat16), wg1_ref[...],
                          preferred_element_type=jnp.float32).astype(z1_ref.dtype)


def _tiled_agg_kernel(a_ref, z_ref, w_ref, b_in_ref, b_out_ref, o_ref, acc_ref, *, final):
    """One GCN hop, column-tiled:  o = act(sum_c A[:,c] @ z[c] + b_in) @ W (+ b_out)."""
    c = pl.program_id(1)

    @pl.when(c == 0)
    def _():
        acc_ref[...] = jnp.zeros_like(acc_ref)

    acc_ref[...] += jnp.dot(a_ref[...], z_ref[...], preferred_element_type=jnp.float32)

    @pl.when(c == pl.num_programs(1) - 1)
    def _():
        h = jnp.maximum(acc_ref[...] + b_in_ref[...], 0.0)
        y = jnp.dot(h.astype(jnp.bfloat16), w_ref[...], preferred_element_type=jnp.float32)
        if final:                       # trace-time flag: post-MLP bias on the last hop
            y = y + b_out_ref[...]
        o_ref[...] = y.astype(o_ref.dtype)


# ---------------------------------------------------------------------------
# Wrapper
# ---------------------------------------------------------------------------
def _round_up(n, m):
    return ((n + m - 1) // m) * m


def _pad2(a, rows, cols):
    out = jnp.zeros((rows, cols), a.dtype)
    return out.at[: a.shape[0], : a.shape[1]].set(a)


def _vmem_limit_bytes():
    # Explicit scoped-VMEM limit (default 16/32 MiB binds long before physical capacity).
    try:
        cap = pltpu.get_tpu_info().vmem_capacity_bytes      # 128 MiB v5e/v6e, 64 MiB v7x
        return max(32 * 1024 * 1024, min(int(cap * 3 // 4), 100 * 1024 * 1024))
    except Exception:
        return 48 * 1024 * 1024


def _forward_fused(x, a_hat, w_pads, b_pads, n, out_dim, vmem_limit):
    n_pad = _round_up(max(n, ROW_PAD_SMALL), ROW_PAD_SMALL)

    x_p = _pad2(x, n_pad, LANE).astype(jnp.bfloat16)
    a_p = _pad2(a_hat, n_pad, n_pad).astype(jnp.bfloat16)    # padded cols MUST be zero
    w_packed = jnp.stack(w_pads)                             # (4, 128, 128) bf16, 1 DMA
    b_packed = jnp.stack(b_pads)                             # (4, 1, 128)  f32,  1 DMA

    # Advisory estimate of the tile work actually executed (padded K/N = 128).
    flops = 8 * n_pad * LANE * LANE + 4 * n_pad * n_pad * LANE
    bytes_accessed = (x_p.size * 2 + a_p.size * 2 + w_packed.size * 2
                      + b_packed.size * 4 + n_pad * LANE * 4)

    out_p = pl.pallas_call(
        _fused_kernel,
        out_shape=jax.ShapeDtypeStruct((n_pad, LANE), jnp.float32),
        grid=(1,),
        in_specs=[
            pl.BlockSpec((n_pad, LANE), lambda i: (0, 0)),
            pl.BlockSpec((n_pad, n_pad), lambda i: (0, 0)),
            pl.BlockSpec((4, LANE, LANE), lambda i: (0, 0, 0)),
            pl.BlockSpec((4, 1, LANE), lambda i: (0, 0, 0)),
        ],
        out_specs=pl.BlockSpec((n_pad, LANE), lambda i: (0, 0)),
        compiler_params=pltpu.CompilerParams(
            dimension_semantics=("arbitrary",), vmem_limit_bytes=vmem_limit),
        cost_estimate=pl.CostEstimate(
            flops=flops, transcendentals=0, bytes_accessed=bytes_accessed),
    )(x_p, a_p, w_packed, b_packed)
    return out_p[:n, :out_dim]


def _forward_tiled(x, a_hat, w_pads, b_pads, n, out_dim, vmem_limit):
    w_pre_p, w_g1_p, w_g2_p, w_post_p = w_pads
    b_pre_p, b_g1_p, b_g2_p, b_post_p = b_pads

    n_pad = _round_up(n, TM)                      # no forced 2*TM minimum (single-TC chips)
    nb_r = n_pad // TM
    # Largest A_hat column tile (reduction axis) that divides n_pad.
    col_tile = next(t for t in (2048, 1024, 512, 256, 128) if n_pad % t == 0)
    nb_c = n_pad // col_tile

    x_p = _pad2(x, n_pad, LANE).astype(jnp.bfloat16)
    a_p = _pad2(a_hat, n_pad, n_pad).astype(jnp.bfloat16)    # padded cols MUST be zero

    cp_rows = pltpu.CompilerParams(dimension_semantics=("parallel",),
                                   vmem_limit_bytes=vmem_limit)
    cp_rows_red = pltpu.CompilerParams(dimension_semantics=("parallel", "arbitrary"),
                                       vmem_limit_bytes=vmem_limit)

    # --- call 1: row-wise pre-MLP + GCN-1 projection --------------------------------
    z1 = pl.pallas_call(
        _tiled_pre_kernel,
        out_shape=jax.ShapeDtypeStruct((n_pad, LANE), jnp.bfloat16),
        grid=(nb_r,),
        in_specs=[pl.BlockSpec((TM, LANE), lambda i: (i, 0)),
                  pl.BlockSpec((LANE, LANE), lambda i: (0, 0)),
                  pl.BlockSpec((1, LANE), lambda i: (0, 0)),
                  pl.BlockSpec((LANE, LANE), lambda i: (0, 0))],
        out_specs=pl.BlockSpec((TM, LANE), lambda i: (i, 0)),
        compiler_params=cp_rows,
        cost_estimate=pl.CostEstimate(
            flops=4 * n_pad * LANE * LANE, transcendentals=0,
            bytes_accessed=x_p.size * 2 + 2 * LANE * LANE * 2 + LANE * 4
                           + n_pad * LANE * 2),
    )(x_p, w_pre_p, b_pre_p, w_g1_p)

    def agg_call(z, w_proj, b_in, b_out, out_dtype, final):
        return pl.pallas_call(
            functools.partial(_tiled_agg_kernel, final=final),
            out_shape=jax.ShapeDtypeStruct((n_pad, LANE), out_dtype),
            grid=(nb_r, nb_c),
            in_specs=[pl.BlockSpec((TM, col_tile), lambda i, c: (i, c)),
                      pl.BlockSpec((col_tile, LANE), lambda i, c: (c, 0)),
                      pl.BlockSpec((LANE, LANE), lambda i, c: (0, 0)),
                      pl.BlockSpec((1, LANE), lambda i, c: (0, 0)),
                      pl.BlockSpec((1, LANE), lambda i, c: (0, 0))],
            out_specs=pl.BlockSpec((TM, LANE), lambda i, c: (i, 0)),
            scratch_shapes=[pltpu.VMEM((TM, LANE), jnp.float32)],
            compiler_params=cp_rows_red,
            cost_estimate=pl.CostEstimate(
                flops=2 * n_pad * n_pad * LANE + 2 * n_pad * LANE * LANE,
                transcendentals=0,
                bytes_accessed=a_p.size * 2
                               + nb_r * int(z.size) * z.dtype.itemsize
                               + LANE * LANE * 2 + 2 * LANE * 4
                               + n_pad * LANE * jnp.dtype(out_dtype).itemsize),
        )(a_p, z, w_proj, b_in, b_out)

    # --- call 2: GCN-1 aggregation + GCN-2 projection (bf16 intermediate) ------------
    z2 = agg_call(z1, w_g2_p, b_g1_p, b_g1_p, jnp.bfloat16, final=False)
    # --- call 3: GCN-2 aggregation + post-MLP (pooling=None -> per-node f32 logits) --
    out_p = agg_call(z2, w_post_p, b_g2_p, b_post_p, jnp.float32, final=True)
    return out_p[:n, :out_dim]


def basegnn_forward(x, a_hat, params, *, force_tiled=False):
    (w_pre, b_pre, w_g1, b_g1, w_g2, b_g2, w_post, b_post) = params
    n = x.shape[0]
    out_dim = w_post.shape[1]
    vmem_limit = _vmem_limit_bytes()

    # Zero-pad all parameters to lane-dense 128-wide slabs (padded rows/cols are zero).
    w_pads = [_pad2(w, LANE, LANE).astype(jnp.bfloat16)
              for w in (w_pre, w_g1, w_g2, w_post)]
    b_pads = [_pad2(b, 1, LANE).astype(jnp.float32)
              for b in (b_pre, b_g1, b_g2, b_post)]

    # Fused single-kernel path whenever A_hat + activations comfortably fit in VMEM.
    n_small = _round_up(max(n, ROW_PAD_SMALL), ROW_PAD_SMALL)
    fused_bytes = (2 * n_small * n_small          # A_hat bf16
                   + 2 * n_small * LANE           # x bf16
                   + 4 * n_small * LANE           # f32 output
                   + 8 * n_small * LANE           # in-flight intermediates headroom
                   + 4 * LANE * LANE * 2 + 4 * LANE * 4)
    if (not force_tiled) and fused_bytes <= int(0.6 * vmem_limit):
        return _forward_fused(x, a_hat, w_pads, b_pads, n, out_dim, vmem_limit)
    return _forward_tiled(x, a_hat, w_pads, b_pads, n, out_dim, vmem_limit)


# ---------------------------------------------------------------------------
# Pure-JAX reference (same bf16-dot / f32-accumulate recipe), params, graph
# ---------------------------------------------------------------------------
def basegnn_reference(x, a_hat, params):
    (w_pre, b_pre, w_g1, b_g1, w_g2, b_g2, w_post, b_post) = params

    def mm(a, b):
        return jnp.dot(a.astype(jnp.bfloat16), b.astype(jnp.bfloat16),
                       preferred_element_type=jnp.float32)

    h = jnp.maximum(mm(x, w_pre) + b_pre, 0.0)            # pre-MLP (ReLU out)
    h = jnp.maximum(mm(a_hat, mm(h, w_g1)) + b_g1, 0.0)   # GCN layer 1
    h = jnp.maximum(mm(a_hat, mm(h, w_g2)) + b_g2, 0.0)   # GCN layer 2 (act_last=True)
    return mm(h, w_post) + b_post                         # post-MLP (final Linear)


def make_params(key, input_dim, hidden_dim, output_dim):
    """Deterministic Glorot-ish init for all Linear layers implied by __init__."""
    def lin(k, fan_in, fan_out):
        kw, kb = jax.random.split(k)
        limit = (6.0 / (fan_in + fan_out)) ** 0.5
        w = jax.random.uniform(kw, (fan_in, fan_out), jnp.float32, -limit, limit)
        b = jax.random.uniform(kb, (1, fan_out), jnp.float32, -limit, limit)
        return w, b

    keys = jax.random.split(key, 4)
    w_pre, b_pre = lin(keys[0], input_dim, hidden_dim)      # pre_nn (1 layer)
    w_g1, b_g1 = lin(keys[1], hidden_dim, hidden_dim)       # gnn layer 1
    w_g2, b_g2 = lin(keys[2], hidden_dim, hidden_dim)       # gnn layer 2
    w_post, b_post = lin(keys[3], hidden_dim, output_dim)   # post_nn (1 layer)
    return (w_pre, b_pre, w_g1, b_g1, w_g2, b_g2, w_post, b_post)


def make_graph(key, num_nodes, input_dim):
    kx, ka = jax.random.split(key)
    x = jax.random.normal(kx, (num_nodes, input_dim), jnp.float32)
    # Deterministic random undirected graph, then GCN normalization in f32 (plain-JAX glue).
    a = (jax.random.uniform(ka, (num_nodes, num_nodes)) < 0.3).astype(jnp.float32)
    a = jnp.maximum(a, a.T)
    a = a + jnp.eye(num_nodes, dtype=jnp.float32)            # self loops
    d_inv_sqrt = 1.0 / jnp.sqrt(jnp.sum(a, axis=1))
    a_hat = a * d_inv_sqrt[:, None] * d_inv_sqrt[None, :]
    return x, a_hat


if __name__ == "__main__":
    NUM_NODES = 16
    INPUT_DIM = 8
    HIDDEN_DIM = 32
    OUTPUT_DIM = 16

    key = jax.random.PRNGKey(0)
    k_graph, k_params, k_graph2 = jax.random.split(key, 3)

    params = make_params(k_params, INPUT_DIM, HIDDEN_DIM, OUTPUT_DIM)

    # --- Fused single-kernel path (default for this size) ---------------------------
    x, a_hat = make_graph(k_graph, NUM_NODES, INPUT_DIM)
    logits = basegnn_forward(x, a_hat, params)
    jax.block_until_ready(logits)
    assert logits.shape == (NUM_NODES, OUTPUT_DIM)
    assert logits.dtype == jnp.float32
    ref = basegnn_reference(x, a_hat, params)
    assert jnp.allclose(logits, ref, atol=1e-2, rtol=1e-2), \
        float(jnp.max(jnp.abs(logits - ref)))

    # --- Row/column-tiled large-N path, exercised at a modest size -------------------
    N2 = 300
    x2, a2 = make_graph(k_graph2, N2, INPUT_DIM)
    logits2 = basegnn_forward(x2, a2, params, force_tiled=True)
    jax.block_until_ready(logits2)
    assert logits2.shape == (N2, OUTPUT_DIM)
    ref2 = basegnn_reference(x2, a2, params)
    assert jnp.allclose(logits2, ref2, atol=1e-2, rtol=1e-2), \
        float(jnp.max(jnp.abs(logits2 - ref2)))

    print("KERNEL_OK")
</pallas_src>

<mosaic_0001>
module attributes {stable_mosaic.version = 11 : i64} {
  func.func @_fused_kernel(%arg0: i32, %arg1: memref<16x128xbf16, #tpu.memory_space<vmem>>, %arg2: memref<16x16xbf16, #tpu.memory_space<vmem>>, %arg3: memref<4x128x128xbf16, #tpu.memory_space<vmem>>, %arg4: memref<4x1x128xf32, #tpu.memory_space<vmem>>, %arg5: memref<16x128xf32, #tpu.memory_space<vmem>>) attributes {dimension_semantics = [#tpu.dimension_semantics<arbitrary>], iteration_bounds = array<i64: 1>, scalar_prefetch = 0 : i64, scratch_operands = 0 : i64, tpu.core_type = #tpu.core_type<tc>, window_params = [{pipeline_mode = #tpu.pipeline_mode<synchronous>, transform_indices = @transform_0, window_bounds = array<i64: 16, 128>}, {pipeline_mode = #tpu.pipeline_mode<synchronous>, transform_indices = @transform_1, window_bounds = array<i64: 16, 16>}, {pipeline_mode = #tpu.pipeline_mode<synchronous>, transform_indices = @transform_2, window_bounds = array<i64: 4, 128, 128>}, {pipeline_mode = #tpu.pipeline_mode<synchronous>, transform_indices = @transform_3, window_bounds = array<i64: 4, 1, 128>}, {pipeline_mode = #tpu.pipeline_mode<synchronous>, transform_indices = @transform_4, window_bounds = array<i64: 16, 128>}]} {
    %c0 = arith.constant 0 : index
    %c0_0 = arith.constant 0 : index
    %0 = vector.load %arg1[%c0, %c0_0] : memref<16x128xbf16, #tpu.memory_space<vmem>>, vector<16x128xbf16>
    %c0_1 = arith.constant 0 : index
    %c0_2 = arith.constant 0 : index
    %c0_3 = arith.constant 0 : index
    %1 = vector.load %arg3[%c0_1, %c0_2, %c0_3] : memref<4x128x128xbf16, #tpu.memory_space<vmem>>, vector<1x128x128xbf16>
    %2 = vector.shape_cast %1 : vector<1x128x128xbf16> to vector<128x128xbf16>
    %cst = arith.constant dense<0.000000e+00> : vector<16x128xf32>
    %3 = tpu.matmul %0, %2, %cst {dimension_numbers = #tpu.dot_dimension_numbers<[1], [0], [0], [1], [0, 0, 1, 1], [], []>} : vector<16x128xbf16>, vector<128x128xbf16>, vector<16x128xf32> -> vector<16x128xf32>
    %c0_4 = arith.constant 0 : index
    %c0_5 = arith.constant 0 : index
    %c0_6 = arith.constant 0 : index
    %4 = vector.load %arg4[%c0_4, %c0_5, %c0_6] : memref<4x1x128xf32, #tpu.memory_space<vmem>>, vector<1x1x128xf32>
    %5 = vector.shape_cast %4 : vector<1x1x128xf32> to vector<1x128xf32>
    %6 = vector.broadcast %5 : vector<1x128xf32> to vector<16x128xf32>
    %7 = arith.addf %3, %6 : vector<16x128xf32>
    %cst_7 = arith.constant 0.000000e+00 : f32
    %8 = vector.broadcast %cst_7 : f32 to vector<16x128xf32>
    %9 = arith.maximumf %7, %8 : vector<16x128xf32>
    %10 = arith.truncf %9 : vector<16x128xf32> to vector<16x128xbf16>
    %c1 = arith.constant 1 : index
    %c0_8 = arith.constant 0 : index
    %c0_9 = arith.constant 0 : index
    %11 = vector.load %arg3[%c1, %c0_8, %c0_9] : memref<4x128x128xbf16, #tpu.memory_space<vmem>>, vector<1x128x128xbf16>
    %12 = vector.shape_cast %11 : vector<1x128x128xbf16> to vector<128x128xbf16>
    %cst_10 = arith.constant dense<0.000000e+00> : vector<16x128xf32>
    %13 = tpu.matmul %10, %12, %cst_10 {dimension_numbers = #tpu.dot_dimension_numbers<[1], [0], [0], [1], [0, 0, 1, 1], [], []>} : vector<16x128xbf16>, vector<128x128xbf16>, vector<16x128xf32> -> vector<16x128xf32>
    %14 = arith.truncf %13 : vector<16x128xf32> to vector<16x128xbf16>
    %c0_11 = arith.constant 0 : index
    %c0_12 = arith.constant 0 : index
    %15 = vector.load %arg2[%c0_11, %c0_12] : memref<16x16xbf16, #tpu.memory_space<vmem>>, vector<16x16xbf16>
    %cst_13 = arith.constant dense<0.000000e+00> : vector<16x128xf32>
    %16 = tpu.matmul %15, %14, %cst_13 {dimension_numbers = #tpu.dot_dimension_numbers<[1], [0], [0], [1], [0, 0, 1, 1], [], []>} : vector<16x16xbf16>, vector<16x128xbf16>, vector<16x128xf32> -> vector<16x128xf32>
    %c1_14 = arith.constant 1 : index
    %c0_15 = arith.constant 0 : index
    %c0_16 = arith.constant 0 : index
    %17 = vector.load %arg4[%c1_14, %c0_15, %c0_16] : memref<4x1x128xf32, #tpu.memory_space<vmem>>, vector<1x1x128xf32>
    %18 = vector.shape_cast %17 : vector<1x1x128xf32> to vector<1x128xf32>
    %19 = vector.broadcast %18 : vector<1x128xf32> to vector<16x128xf32>
    %20 = arith.addf %16, %19 : vector<16x128xf32>
    %cst_17 = arith.constant 0.000000e+00 : f32
    %21 = vector.broadcast %cst_17 : f32 to vector<16x128xf32>
    %22 = arith.maximumf %20, %21 : vector<16x128xf32>
    %23 = arith.truncf %22 : vector<16x128xf32> to vector<16x128xbf16>
    %c2 = arith.constant 2 : index
    %c0_18 = arith.constant 0 : index
    %c0_19 = arith.constant 0 : index
    %24 = vector.load %arg3[%c2, %c0_18, %c0_19] : memref<4x128x128xbf16, #tpu.memory_space<vmem>>, vector<1x128x128xbf16>
    %25 = vector.shape_cast %24 : vector<1x128x128xbf16> to vector<128x128xbf16>
    %cst_20 = arith.constant dense<0.000000e+00> : vector<16x128xf32>
    %26 = tpu.matmul %23, %25, %cst_20 {dimension_numbers = #tpu.dot_dimension_numbers<[1], [0], [0], [1], [0, 0, 1, 1], [], []>} : vector<16x128xbf16>, vector<128x128xbf16>, vector<16x128xf32> -> vector<16x128xf32>
    %27 = arith.truncf %26 : vector<16x128xf32> to vector<16x128xbf16>
    %c0_21 = arith.constant 0 : index
    %c0_22 = arith.constant 0 : index
    %28 = vector.load %arg2[%c0_21, %c0_22] : memref<16x16xbf16, #tpu.memory_space<vmem>>, vector<16x16xbf16>
    %cst_23 = arith.constant dense<0.000000e+00> : vector<16x128xf32>
    %29 = tpu.matmul %28, %27, %cst_23 {dimension_numbers = #tpu.dot_dimension_numbers<[1], [0], [0], [1], [0, 0, 1, 1], [], []>} : vector<16x16xbf16>, vector<16x128xbf16>, vector<16x128xf32> -> vector<16x128xf32>
    %c2_24 = arith.constant 2 : index
    %c0_25 = arith.constant 0 : index
    %c0_26 = arith.constant 0 : index
    %30 = vector.load %arg4[%c2_24, %c0_25, %c0_26] : memref<4x1x128xf32, #tpu.memory_space<vmem>>, vector<1x1x128xf32>
    %31 = vector.shape_cast %30 : vector<1x1x128xf32> to vector<1x128xf32>
    %32 = vector.broadcast %31 : vector<1x128xf32> to vector<16x128xf32>
    %33 = arith.addf %29, %32 : vector<16x128xf32>
    %cst_27 = arith.constant 0.000000e+00 : f32
    %34 = vector.broadcast %cst_27 : f32 to vector<16x128xf32>
    %35 = arith.maximumf %33, %34 : vector<16x128xf32>
    %36 = arith.truncf %35 : vector<16x128xf32> to vector<16x128xbf16>
    %c3 = arith.constant 3 : index
    %c0_28 = arith.constant 0 : index
    %c0_29 = arith.constant 0 : index
    %37 = vector.load %arg3[%c3, %c0_28, %c0_29] : memref<4x128x128xbf16, #tpu.memory_space<vmem>>, vector<1x128x128xbf16>
    %38 = vector.shape_cast %37 : vector<1x128x128xbf16> to vector<128x128xbf16>
    %cst_30 = arith.constant dense<0.000000e+00> : vector<16x128xf32>
    %39 = tpu.matmul %36, %38, %cst_30 {dimension_numbers = #tpu.dot_dimension_numbers<[1], [0], [0], [1], [0, 0, 1, 1], [], []>} : vector<16x128xbf16>, vector<128x128xbf16>, vector<16x128xf32> -> vector<16x128xf32>
    %c3_31 = arith.constant 3 : index
    %c0_32 = arith.constant 0 : index
    %c0_33 = arith.constant 0 : index
    %40 = vector.load %arg4[%c3_31, %c0_32, %c0_33] : memref<4x1x128xf32, #tpu.memory_space<vmem>>, vector<1x1x128xf32>
    %41 = vector.shape_cast %40 : vector<1x1x128xf32> to vector<1x128xf32>
    %42 = vector.broadcast %41 : vector<1x128xf32> to vector<16x128xf32>
    %43 = arith.addf %39, %42 : vector<16x128xf32>
    %c0_34 = arith.constant 0 : index
    %c0_35 = arith.constant 0 : index
    %44 = vector.load %arg5[%c0_34, %c0_35] : memref<16x128xf32, #tpu.memory_space<vmem>>, vector<16x128xf32>
    tpu.vector_store %arg5[%c0_34, %c0_35], %43 {strides = array<i32>} : memref<16x128xf32, #tpu.memory_space<vmem>>, vector<16x128xf32>,
    return
  }
  func.func @transform_0(%arg0: i32) -> (i32, i32) {
    %c0_i32 = arith.constant 0 : i32
    %c0_i32_0 = arith.constant 0 : i32
    %c0_i32_1 = arith.constant 0 : i32
    return %c0_i32, %c0_i32_0 : i32, i32
  }
  func.func @transform_1(%arg0: i32) -> (i32, i32) {
    %c0_i32 = arith.constant 0 : i32
    %c0_i32_0 = arith.constant 0 : i32
    %c0_i32_1 = arith.constant 0 : i32
    return %c0_i32, %c0_i32_0 : i32, i32
  }
  func.func @transform_2(%arg0: i32) -> (i32, i32, i32) {
    %c0_i32 = arith.constant 0 : i32
    %c0_i32_0 = arith.constant 0 : i32
    %c0_i32_1 = arith.constant 0 : i32
    %c0_i32_2 = arith.constant 0 : i32
    return %c0_i32, %c0_i32_0, %c0_i32_1 : i32, i32, i32
  }
  func.func @transform_3(%arg0: i32) -> (i32, i32, i32) {
    %c0_i32 = arith.constant 0 : i32
    %c0_i32_0 = arith.constant 0 : i32
    %c0_i32_1 = arith.constant 0 : i32
    %c0_i32_2 = arith.constant 0 : i32
    return %c0_i32, %c0_i32_0, %c0_i32_1 : i32, i32, i32
  }
  func.func @transform_4(%arg0: i32) -> (i32, i32) {
    %c0_i32 = arith.constant 0 : i32
    %c0_i32_0 = arith.constant 0 : i32
    %c0_i32_1 = arith.constant 0 : i32
    return %c0_i32, %c0_i32_0 : i32, i32
  }
}

</mosaic_0001>

<bundles_post_ra>
// kernel: tpu_custom_call.1
= control target key start
LH: loop header
LB: loop body
LE: loop exit
PB: predicated region body
PF: predicated region fallthrough
CT: control target
= control target key end

     0   :  { %9 = vsyncpa [#allocation3], 0  ;;  %s1118_s0 = inlined_call_operand.hbm [shape: bf16[16,128], index: 0, kind: input, shape index: {}]   ;;  %s1119_s1 = inlined_call_operand.hbm [shape: bf16[16,16], index: 1, kind: input, shape index: {}]   ;;  %s1120_s2 = inlined_call_operand.hbm [shape: bf16[4,128,128], index: 2, kind: input, shape index: {}]   ;;  %s1121_s3 = inlined_call_operand.vmem [shape: f32[4,1,128], index: 3, kind: input, shape index: {}]   ;;  %s1122_s4 = inlined_call_operand.hbm [shape: f32[16,128], index: 4, kind: output, shape index: {}]  }
   0x1   :  { %10 = vsyncpa [#allocation6], 0 }
   0x2   :  { %11 = vsyncpa [#allocation4], 0  ;;  %s959_s15 = smov [#allocation5]   ;;  %s960_s17 = smov [#allocation2]  }
   0x3   :  { %s29_s16 = sshll.u32 %s959_s15, 4  ;;  %s17_s18 = sshll.u32 %s960_s17, 4  ;;  %s30_s16 = int_to_ptr.vmem [resolvable:$true] %s29_s16  ;;  %s994_s18 = int_to_ptr.vmem [resolvable:$true] %s17_s18 }
   0x4   :  { %s865_s21 = scalar_lea.hbm %s1119_s1, 128 }
   0x5   :  { %p866_p0 = scmp.ne.s32.totalorder %s1119_s1, %s865_s21  ;;  %p869_p1 = scmp.lt.u32.totalorder %s865_s21, %s1119_s1 }
   0x7   :  { %p871_p2 = pnand %p869_p1, %p866_p0 }
   0x9   :  { %874 = shalt.err (!%p871_p2)
}
   0xa   :  { %s875_s26 = scalar_lea.vmem %s30_s16, 128  ;;  %p880_p4 = scmp.lt.s32.totalorder %s30_s16, %s30_s16 }
   0xb   :  { %p876_p3 = scmp.ne.s32.totalorder %s30_s16, %s875_s26  ;;  %p881_p5 = scmp.lt.s32.totalorder %s875_s26, %s875_s26 }
   0xd   :  { %p882_p6 = por %p881_p5, %p880_p4 }
   0xf   :  { %p883_p7 = pnand %p882_p6, %p876_p3 }
  0x11   :  { %886 = shalt.err (!%p883_p7)
}
  0x12   :  { %s961_s27 = smov 64   ;;  %s962_s28 = smov 4  }
  0x13   :  { %35 = dma.hbm_to_vmem [thread:$0]  %s1119_s1, 128, %s30_s16, [#allocation6], %s961_s27, %s961_s27, %s962_s28  }
  0x14   :  { %s887_s7 = scalar_lea.hbm %s1118_s0, 128 }
  0x15   :  { %p888_p8 = scmp.ne.s32.totalorder %s1118_s0, %s887_s7  ;;  %p891_p9 = scmp.lt.u32.totalorder %s887_s7, %s1118_s0 }
  0x17   :  { %p893_p10 = pnand %p891_p9, %p888_p8 }
  0x19   :  { %896 = shalt.err (!%p893_p10)
}
  0x1a   :  { %s897_s12 = scalar_lea.vmem %s994_s18, 128  ;;  %p902_p12 = scmp.lt.s32.totalorder %s994_s18, %s994_s18 }
  0x1b   :  { %p898_p11 = scmp.ne.s32.totalorder %s994_s18, %s897_s12  ;;  %p903_p13 = scmp.lt.s32.totalorder %s897_s12, %s897_s12 }
  0x1d   :  { %p904_p0 = por %p903_p13, %p902_p12 }
  0x1f   :  { %p905_p1 = pnand %p904_p0, %p898_p11 }
  0x21   :  { %908 = shalt.err (!%p905_p1)
}
  0x22   :  { %23 = dma.hbm_to_vmem [thread:$0]  %s1118_s0, 128, %s994_s18, [#allocation3], %s961_s27, %s961_s27, %s962_s28  }
  0x23   :  { %s963_s14 = smov [#allocation7]   ;;  %s909_s19 = scalar_lea.hbm %s1120_s2, 4096 }
  0x24   :  { %s41_s15 = sshll.u32 %s963_s14, 4  ;;  %p910_p2 = scmp.ne.s32.totalorder %s1120_s2, %s909_s19  ;;  %s42_s15 = int_to_ptr.vmem [resolvable:$true] %s41_s15 }
  0x25   :  { %p913_p3 = scmp.lt.u32.totalorder %s909_s19, %s1120_s2 }
  0x27   :  { %p915_p4 = pnand %p913_p3, %p910_p2 }
  0x29   :  { %918 = shalt.err (!%p915_p4)
}
  0x2a   :  { %s919_s24 = scalar_lea.vmem %s42_s15, 4096  ;;  %p924_p6 = scmp.lt.s32.totalorder %s42_s15, %s42_s15 }
  0x2b   :  { %p920_p5 = scmp.ne.s32.totalorder %s42_s15, %s919_s24  ;;  %p925_p7 = scmp.lt.s32.totalorder %s919_s24, %s919_s24 }
  0x2d   :  { %p926_p8 = por %p925_p7, %p924_p6 }
  0x2f   :  { %p927_p9 = pnand %p926_p8, %p920_p5 }
  0x31   :  { %930 = shalt.err (!%p927_p9)
}
  0x32   :  { %47 = dma.hbm_to_vmem [thread:$0]  %s1120_s2, 4096, %s42_s15, [#allocation6], %s961_s27, %s961_s27, %s962_s28  }
  0x33   :  { %953 = dma.done.wait [#allocation3], 128  }
  0x34   :  { %954 = vsyncadd [#allocation3], 4294967168 }
  0x35   :  { %955 = dma.done.wait [#allocation6], 4224  }
  0x36   :  { %956 = vsyncadd [#allocation6], 4294963072  ;;  %v964_v0 = vmov 0.0   ;;  %vm965_vm0 = vmmov 0   ;;  %v831_v1 = vld [vmem:[#allocation7] sm:$0xff]   ;;  %v832_v2 = vld [vmem:[#allocation7 + $0x8] sm:$0xff]  }
  0x37   :  { %729 = vmatprep.subr.bf16.mxu0 %v964_v0  ;;  %745 = vmatprep.mubr.msk.bf16.mxu0 %vm965_vm0, %v964_v0  ;;  %v833_v3 = vld [vmem:[#allocation7 + $0x10] sm:$0xff]   ;;  %v840_v4 = vld [vmem:[#allocation7 + $0x40] sm:$0xff]   ;;  %v834_v5 = vld [vmem:[#allocation7 + $0x18] sm:$0xff]   ;;  %vm305_vm1 = vcmask 130048   ;;  %s966_s6 = smov [#allocation8]  }
  0x38   :  { %749 = vmatprep.subr.bf16.mxu1 %v964_v0  ;;  %765 = vmatprep.mubr.msk.bf16.mxu1 %vm965_vm0, %v964_v0  ;;  %v841_v6 = vld [vmem:[#allocation7 + $0x48] sm:$0xff]   ;;  %v835_v7 = vld [vmem:[#allocation7 + $0x20] sm:$0xff]   ;;  %v842_v8 = vld [vmem:[#allocation7 + $0x50] sm:$0xff]   ;;  %s633_s7 = sshll.u32 %s966_s6, 4  ;;  %s634_s7 = int_to_ptr.vmem [resolvable:$true] %s633_s7 }
  0x39   :  { %730 = vmatpush3.bf16.msra.mxu0 %v831_v1  ;;  %750 = vmatpush3.bf16.msra.mxu1 %v840_v4  ;;  %v836_v9 = vld [vmem:[#allocation7 + $0x28] sm:$0xff]   ;;  %v843_v10 = vld [vmem:[#allocation7 + $0x58] sm:$0xff]   ;;  %v837_v11 = vld [vmem:[#allocation7 + $0x30] sm:$0xff]   ;;  %s931_s8 = scalar_lea.vmem %s634_s7, 256  ;;  %p936_p11 = scmp.lt.s32.totalorder %s634_s7, %s634_s7 }
  0x3a   :  { %731 = vmatprep.subr.bf16.mxu0 %v964_v0  ;;  %751 = vmatprep.subr.bf16.mxu1 %v964_v0  ;;  %v844_v12 = vld [vmem:[#allocation7 + $0x60] sm:$0xff]   ;;  %v838_v13 = vld [vmem:[#allocation7 + $0x38] sm:$0xff]   ;;  %v845_v14 = vld [vmem:[#allocation7 + $0x68] sm:$0xff]   ;;  %p932_p10 = scmp.ne.s32.totalorder %s634_s7, %s931_s8  ;;  %p937_p12 = scmp.lt.s32.totalorder %s931_s8, %s931_s8 }
  0x3b   :  { %v839_v15 = vld [vmem:[#allocation2] sm:$0xff]   ;;  %v847_v17 = vld [vmem:[#allocation7 + $0x78] sm:$0xff]   ;;  %v849_v34 = vld [vmem:[#allocation7 + $0x80] sm:$0xff]  }
  0x3c   :  { %v846_v16 = vld [vmem:[#allocation7 + $0x70] sm:$0xff]   ;;  %v848_v33 = vld [vmem:[#allocation5] sm:$0xff]   ;;  %v850_v35 = vld [vmem:[#allocation7 + $0x88] sm:$0xff]   ;;  %p938_p13 = por %p937_p12, %p936_p11 }
  0x3d   :  { %732 = vmatpush3.bf16.msra.mxu0 %v832_v2  ;;  %752 = vmatpush3.bf16.msra.mxu1 %v841_v6  ;;  %v646_v18 = vld [vmem:[%s1121_s3] ss:$0 sm:$0xff]  ;;  %v852_v37 = vld [vmem:[#allocation7 + $0x98] sm:$0xff]   ;;  %v853_v38 = vld [vmem:[#allocation7 + $0xa0] sm:$0xff]  }
  0x3e   :  { %733 = vmatprep.subr.bf16.mxu0 %v964_v0  ;;  %753 = vmatprep.subr.bf16.mxu1 %v964_v0  ;;  %v851_v36 = vld [vmem:[#allocation7 + $0x90] sm:$0xff]   ;;  %v854_v39 = vld [vmem:[#allocation7 + $0xa8] sm:$0xff]   ;;  %v856_v41 = vld [vmem:[#allocation7 + $0xb8] sm:$0xff]   ;;  %p939_p0 = pnand %p938_p13, %p932_p10 }
  0x3f   :  { %v855_v40 = vld [vmem:[#allocation7 + $0xb0] sm:$0xff]   ;;  %v857_v57 = vld [vmem:[#allocation7 + $0xc0] sm:$0xff]   ;;  %v858_v58 = vld [vmem:[#allocation7 + $0xc8] sm:$0xff]  }
  0x40   :  { %v665_v42 = vld [vmem:[%s1121_s3 + $0x1] ss:$0 sm:$0xff]  ;;  %v860_v60 = vld [vmem:[#allocation7 + $0xd8] sm:$0xff]   ;;  %v861_v61 = vld [vmem:[#allocation7 + $0xe0] sm:$0xff]  }
  0x41   :  { %734 = vmatpush3.bf16.msra.mxu0 %v833_v3  ;;  %754 = vmatpush3.bf16.msra.mxu1 %v842_v8  ;;  %v859_v59 = vld [vmem:[#allocation7 + $0xd0] sm:$0xff]   ;;  %v862_v62 = vld [vmem:[#allocation7 + $0xe8] sm:$0xff]   ;;  %v864_v1 = vld [vmem:[#allocation7 + $0xf8] sm:$0xff]  }
  0x42   :  { %735 = vmatprep.subr.bf16.mxu0 %v964_v0  ;;  %755 = vmatprep.subr.bf16.mxu1 %v964_v0  ;;  %v863_v63 = vld [vmem:[#allocation7 + $0xf0] sm:$0xff]  }
  0x43   :  { %v677_v2 = vld [vmem:[%s1121_s3 + $0x2] ss:$0 sm:$0xff] }
  0x45   :  { %736 = vmatpush3.bf16.msra.mxu0 %v834_v5  ;;  %756 = vmatpush3.bf16.msra.mxu1 %v843_v10 }
  0x46   :  { %737 = vmatprep.subr.bf16.mxu0 %v964_v0  ;;  %757 = vmatprep.subr.bf16.mxu1 %v964_v0 }
  0x49   :  { %738 = vmatpush3.bf16.msra.mxu0 %v835_v7  ;;  %758 = vmatpush3.bf16.msra.mxu1 %v844_v12 }
  0x4a   :  { %739 = vmatprep.subr.bf16.mxu0 %v964_v0  ;;  %759 = vmatprep.subr.bf16.mxu1 %v964_v0 }
  0x4d   :  { %740 = vmatpush3.bf16.msra.mxu0 %v836_v9  ;;  %760 = vmatpush3.bf16.msra.mxu1 %v845_v14 }
  0x4e   :  { %741 = vmatprep.subr.bf16.mxu0 %v964_v0  ;;  %761 = vmatprep.subr.bf16.mxu1 %v964_v0 }
  0x51   :  { %742 = vmatpush3.bf16.msra.mxu0 %v837_v11  ;;  %762 = vmatpush3.bf16.msra.mxu1 %v846_v16 }
  0x52   :  { %743 = vmatprep.subr.bf16.mxu0 %v964_v0  ;;  %763 = vmatprep.subr.bf16.mxu1 %v964_v0 }
  0x55   :  { %744 = vmatpush3.bf16.msra.mxu0 %v838_v13  ;;  %764 = vmatpush3.bf16.msra.mxu1 %v847_v17 }
  0x56   :  { %795 = vmatprep.subr.bf16.mxu0 %v964_v0  ;;  %769 = vmatprep.subr.bf16.mxu1 %v964_v0 }
  0x58   :  { %746 = vmatmul.mubr.bf16.vlgmr.msra.gmra.mrb[0].mxu0 %v839_v15 }
  0x59   :  { %797 = vmatprep.mubr.msk.bf16.mxu0 %vm965_vm0, %v964_v0 }
 0x12b   :  { %v173_v19 = vpop.f32.mrb[0].mxu0 }
 0x12c   :  { %v174_v20 = vadd.f32 %v646_v18, %v173_v19  ;;  %v747_v21 = vpop.f32.mrb[1].mxu0 }
 0x12d   :  { %v176_v22 = vpop.f32.mrb[2].mxu0 }
 0x12e   :  { %v177_v23 = vadd.f32 %v646_v18, %v176_v22  ;;  %v748_v24 = vpop.f32.mrb[3].mxu0  ;;  %v180_v25 = vmax.f32 %v174_v20, 0.0 }
 0x130   :  { %v181_v26 = vmax.f32 %v177_v23, 0.0 }
 0x132   :  { %v182_v27 = vpack.c.bf16 %v181_v26, %v180_v25 }
 0x134   :  { %766 = vmatmul.mubr.bf16.vlgmr.msra.gmra.mrb[0].mxu1 %v182_v27 }
 0x135   :  { %771 = vmatprep.mubr.msk.bf16.mxu1 %vm965_vm0, %v964_v0 }
 0x207   :  { %v282_v28 = vpop.f32.mrb[0].mxu1 }
 0x208   :  { %v767_v29 = vpop.f32.mrb[1].mxu1 }
 0x209   :  { %v285_v30 = vpop.f32.mrb[2].mxu1 }
 0x20a   :  { %v289_v31 = vpack.c.bf16 %v285_v30, %v282_v28  ;;  %v768_v32 = vpop.f32.mrb[3].mxu1 }
 0x20c   :  { %770 = vmatpush3.bf16.msra.mxu1 %v289_v31 }
 0x20d   :  { %775 = vmatprep.subr.bf16.mxu1 %v964_v0 }
 0x20f   :  { %772 = vmatmul.mubr.msk.bf16.vlgmr.msra.gmra.mrb[4].mxu1 %vm305_vm1, %v848_v33 }
 0x210   :  { %776 = vmatpush3.bf16.msra.mxu1 %v849_v34  ;;  %791 = vmatprep.mubr.msk.bf16.mxu1 %vm965_vm0, %v964_v0 }
 0x211   :  { %777 = vmatprep.subr.bf16.mxu1 %v964_v0 }
 0x214   :  { %778 = vmatpush3.bf16.msra.mxu1 %v850_v35 }
 0x215   :  { %779 = vmatprep.subr.bf16.mxu1 %v964_v0 }
 0x218   :  { %780 = vmatpush3.bf16.msra.mxu1 %v851_v36 }
 0x219   :  { %781 = vmatprep.subr.bf16.mxu1 %v964_v0 }
 0x21c   :  { %782 = vmatpush3.bf16.msra.mxu1 %v852_v37 }
 0x21d   :  { %783 = vmatprep.subr.bf16.mxu1 %v964_v0 }
 0x220   :  { %784 = vmatpush3.bf16.msra.mxu1 %v853_v38 }
 0x221   :  { %785 = vmatprep.subr.bf16.mxu1 %v964_v0 }
 0x224   :  { %786 = vmatpush3.bf16.msra.mxu1 %v854_v39 }
 0x225   :  { %787 = vmatprep.subr.bf16.mxu1 %v964_v0 }
 0x228   :  { %788 = vmatpush3.bf16.msra.mxu1 %v855_v40 }
 0x229   :  { %789 = vmatprep.subr.bf16.mxu1 %v964_v0 }
 0x22c   :  { %790 = vmatpush3.bf16.msra.mxu1 %v856_v41 }
 0x2e2   :  { %v343_v43 = vpop.f32.mrb[4].mxu1 }
 0x2e3   :  { %v344_v44 = vadd.f32 %v665_v42, %v343_v43  ;;  %v773_v45 = vpop.f32.mrb[5].mxu1 }
 0x2e4   :  { %v346_v46 = vpop.f32.mrb[6].mxu1 }
 0x2e5   :  { %v347_v47 = vadd.f32 %v665_v42, %v346_v46  ;;  %v774_v48 = vpop.f32.mrb[7].mxu1  ;;  %v350_v49 = vmax.f32 %v344_v44, 0.0 }
 0x2e7   :  { %v351_v50 = vmax.f32 %v347_v47, 0.0 }
 0x2e9   :  { %v352_v51 = vpack.c.bf16 %v351_v50, %v350_v49 }
 0x2eb   :  { %792 = vmatmul.mubr.bf16.vlgmr.msra.gmra.mrb[8].mxu1 %v352_v51 }
 0x3be   :  { %v452_v52 = vpop.f32.mrb[8].mxu1 }
 0x3bf   :  { %v793_v53 = vpop.f32.mrb[9].mxu1 }
 0x3c0   :  { %v455_v54 = vpop.f32.mrb[10].mxu1 }
 0x3c1   :  { %v459_v55 = vpack.c.bf16 %v455_v54, %v452_v52  ;;  %v794_v56 = vpop.f32.mrb[11].mxu1 }
 0x3c3   :  { %796 = vmatpush3.bf16.msra.mxu0 %v459_v55 }
 0x3c4   :  { %801 = vmatprep.subr.bf16.mxu0 %v964_v0 }
 0x3c6   :  { %798 = vmatmul.mubr.msk.bf16.vlgmr.msra.gmra.mrb[4].mxu0 %vm305_vm1, %v848_v33 }
 0x3c7   :  { %802 = vmatpush3.bf16.msra.mxu0 %v857_v57  ;;  %817 = vmatprep.mubr.msk.bf16.mxu0 %vm965_vm0, %v964_v0 }
 0x3c8   :  { %803 = vmatprep.subr.bf16.mxu0 %v964_v0 }
 0x3cb   :  { %804 = vmatpush3.bf16.msra.mxu0 %v858_v58 }
 0x3cc   :  { %805 = vmatprep.subr.bf16.mxu0 %v964_v0 }
 0x3cf   :  { %806 = vmatpush3.bf16.msra.mxu0 %v859_v59 }
 0x3d0   :  { %807 = vmatprep.subr.bf16.mxu0 %v964_v0 }
 0x3d3   :  { %808 = vmatpush3.bf16.msra.mxu0 %v860_v60 }
 0x3d4   :  { %809 = vmatprep.subr.bf16.mxu0 %v964_v0 }
 0x3d7   :  { %810 = vmatpush3.bf16.msra.mxu0 %v861_v61 }
 0x3d8   :  { %811 = vmatprep.subr.bf16.mxu0 %v964_v0 }
 0x3db   :  { %812 = vmatpush3.bf16.msra.mxu0 %v862_v62 }
 0x3dc   :  { %813 = vmatprep.subr.bf16.mxu0 %v964_v0 }
 0x3df   :  { %814 = vmatpush3.bf16.msra.mxu0 %v863_v63 }
 0x3e0   :  { %815 = vmatprep.subr.bf16.mxu0 %v964_v0  ;;  %v680_v0 = vld [vmem:[%s1121_s3 + $0x3] ss:$0 sm:$0xff] }
 0x3e3   :  { %816 = vmatpush3.bf16.msra.mxu0 %v864_v1 }
 0x499   :  { %v502_v3 = vpop.f32.mrb[4].mxu0 }
 0x49a   :  { %v503_v4 = vadd.f32 %v677_v2, %v502_v3  ;;  %v799_v5 = vpop.f32.mrb[5].mxu0 }
 0x49b   :  { %v505_v6 = vpop.f32.mrb[6].mxu0 }
 0x49c   :  { %v506_v7 = vadd.f32 %v677_v2, %v505_v6  ;;  %v800_v8 = vpop.f32.mrb[7].mxu0  ;;  %v509_v9 = vmax.f32 %v503_v4, 0.0 }
 0x49e   :  { %v510_v10 = vmax.f32 %v506_v7, 0.0 }
 0x4a0   :  { %v511_v11 = vpack.c.bf16 %v510_v10, %v509_v9 }
 0x4a2   :  { %818 = vmatmul.mubr.bf16.vlgmr.msra.gmra.mrb[8].mxu0 %v511_v11 }
 0x575   :  { %v619_v12 = vpop.f32.mrb[8].mxu0 }
 0x576   :  { %v620_v13 = vadd.f32 %v680_v0, %v619_v12  ;;  %v819_v14 = vpop.f32.mrb[9].mxu0 }
 0x577   :  { %v622_v15 = vpop.f32.mrb[10].mxu0 }
 0x578   :  { %626 = vst [vmem:[#allocation8] sm:$0xff] %v620_v13  ;;  %v623_v16 = vadd.f32 %v680_v0, %v622_v15  ;;  %v820_v17 = vpop.f32.mrb[11].mxu0 }
 0x57a   :  { %627 = vst [vmem:[#allocation8 + $0x8] sm:$0xff] %v623_v16 }
 0x57b   :  { %942 = shalt.err (!%p939_p0)
}
 0x57c   :  { %s943_s10 = scalar_lea.hbm %s1122_s4, 256 }
 0x57d   :  { %p944_p1 = scmp.ne.s32.totalorder %s1122_s4, %s943_s10  ;;  %p947_p2 = scmp.lt.u32.totalorder %s943_s10, %s1122_s4 }
 0x57f   :  { %p949_p3 = pnand %p947_p2, %p944_p1 }
 0x581   :  { %952 = shalt.err (!%p949_p3)
}
 0x582   :  { %s967_s14 = smov 128   ;;  %s968_s15 = smov 8  }
 0x583   :  { %639 = dma.vmem_to_hbm [thread:$0]  %s634_s7, 256, %s1122_s4, [#allocation4], %s967_s14, %s967_s14, %s968_s15  }
 0x584   :  { %957 = dma.done.wait [#allocation4], 256  }
 0x585   :  { %958 = vsyncadd [#allocation4], 4294967040 }
 0x586   :  { %643 = vsyncpa [#allocation3], 1 }
 0x587   :  { %644 = vsyncpa [#allocation6], 1 }
 0x588   :  { %645 = vsyncpa [#allocation4], 1 }

</bundles_post_ra>
